<compile_context>
chip_gen: v7x
topology: tpu7x:2x2x1
jax: 0.10.0
libtpu: 0.0.40
codegen_flags: <defaults>
</compile_context>

<pallas_src>
import functools

import jax
import jax.numpy as jnp
from jax.experimental import pallas as pl
from jax.experimental.pallas import tpu as pltpu


def fap_kernel(x_ref, w_ref, b_ref, out_ref, acc_ref, *, total_t, tile_t, rem_t):
    # x_ref  : (tB, C, F, tT)   VMEM
    # w_ref  : (C, 1)           VMEM  (Conv1d(C, 1, k=1) weight)
    # b_ref  : (1, 1)           SMEM  (Conv1d bias, scalar)
    # out_ref: (1, tB, C)       VMEM
    # acc_ref: (tB, C, F, 128)  VMEM f32, lane-preserving time-sum accumulator
    t = pl.program_id(1)
    last_t = pl.num_programs(1) - 1

    @pl.when(t == 0)
    def _():
        acc_ref[...] = jnp.zeros_like(acc_ref)

    def accumulate(valid_t):
        # Accumulate `valid_t` time columns of this tile using static 128-lane
        # chunk slices (no reshape, no cross-lane reduce in the hot loop).
        n_full = valid_t // 128
        tail = valid_t % 128
        for k in range(n_full):
            acc_ref[...] += x_ref[:, :, :, k * 128:(k + 1) * 128].astype(jnp.float32)
        if tail:
            s = n_full * 128
            acc_ref[:, :, :, :tail] += x_ref[:, :, :, s:s + tail].astype(jnp.float32)

    if rem_t == 0:
        accumulate(tile_t)
    else:
        # Only the last time tile has padded columns; keep the full-tile path
        # mask-free and handle the remainder with static partial slices.
        @pl.when(t != last_t)
        def _():
            accumulate(tile_t)

        @pl.when(t == last_t)
        def _():
            accumulate(rem_t)

    @pl.when(t == last_t)
    def _():
        # Mean over the TRUE time length: single 128->1 lane reduce, once.
        x_mean = jnp.sum(acc_ref[...], axis=-1) * (1.0 / float(total_t))   # (tB, C, F)

        # Conv1d(C, 1, k=1): per-frequency dot over channels (sublane reduce, once).
        w = w_ref[...].astype(jnp.float32)                                 # (C, 1)
        logits = jnp.sum(w[None, :, :] * x_mean, axis=1) + b_ref[0, 0]     # (tB, F)

        # sigmoid -> softmax over frequency (exact division; runs once).
        att = 1.0 / (1.0 + jnp.exp(-logits))
        att_max = jnp.max(att, axis=-1, keepdims=True)
        att_exp = jnp.exp(att - att_max)
        att = att_exp / jnp.sum(att_exp, axis=-1, keepdims=True)           # (tB, F)

        # Attentive pooling: weighted sum over frequency.
        pooled = jnp.sum(x_mean * att[:, None, :], axis=-1)                # (tB, C)
        out_ref[...] = pooled[None].astype(out_ref.dtype)                  # (1, tB, C)


def frequency_attentive_pooling(x, w, b):
    """x: (B, C, F, T); w: (1, C) Conv1d weight; b: (1, 1) Conv1d bias -> (B, C)."""
    B, C, F, T = x.shape
    w2 = jnp.asarray(w).reshape(C, 1).astype(jnp.float32)
    b2 = jnp.asarray(b).reshape(1, 1).astype(jnp.float32)
    itemsize = x.dtype.itemsize

    # ---- per-generation VMEM budget (v7x: 64 MiB; v5e/v6e: 128 MiB physical) ----
    try:
        vmem_cap = int(getattr(pltpu.get_tpu_info(), "vmem_capacity_bytes", 64 << 20))
    except Exception:
        vmem_cap = 64 << 20  # conservative (v7x) default
    budget = min(int(vmem_cap * 0.75), 96 << 20)     # headroom for Mosaic scratch

    acc_bytes_per_b = C * F * 128 * 4                # lane-preserving f32 accumulator
    overhead = 4 << 20

    def fits(tb, tt):
        blk = tb * C * F * tt * itemsize             # casts happen per 128-lane chunk,
        return 2 * blk + tb * acc_bytes_per_b + overhead <= budget  # no f32 tile temp

    # ---- time tile: as large as fits (multiple of 128, or the full T) ----
    if T <= 2048 and fits(1, T):
        tT = T
    else:
        tT = 0
        for cand in (2048, 1024, 512, 256, 128):
            if cand <= T and fits(1, cand):
                tT = cand
                break
        if tT == 0:
            tT = min(T, 128)

    # ---- batch blocking: amortize per-grid-step overhead when blocks are small ----
    tB = 1
    if C * F * tT * itemsize <= (2 << 20):
        for cand in range(min(B, 16), 1, -1):
            if B % cand == 0 and fits(cand, tT):
                tB = cand
                break

    num_t = pl.cdiv(T, tT)
    rem_t = T % tT
    blk = tB * C * F * tT * itemsize
    need = 2 * blk + tB * acc_bytes_per_b + overhead
    vmem_limit = int(min(max(need, 16 << 20), vmem_cap - (8 << 20)))

    # TODO(synk): on v7x with B < 2, add a second "parallel" grid axis (e.g. split T
    # into halves with partial accumulators) so both TensorCores get work.

    kernel = functools.partial(fap_kernel, total_t=T, tile_t=tT, rem_t=rem_t)

    out = pl.pallas_call(
        kernel,
        out_shape=jax.ShapeDtypeStruct((B // tB, tB, C), x.dtype),
        grid=(B // tB, num_t),
        in_specs=[
            # streamed input tile: (tB, C, F, tT)
            pl.BlockSpec((tB, C, F, tT), lambda bi, ti: (bi, 0, 0, ti)),
            # conv weight, resident
            pl.BlockSpec((C, 1), lambda bi, ti: (0, 0)),
            # bias as an SMEM scalar
            pl.BlockSpec(memory_space=pltpu.MemorySpace.SMEM),
        ],
        out_specs=pl.BlockSpec((1, tB, C), lambda bi, ti: (bi, 0, 0)),
        scratch_shapes=[pltpu.VMEM((tB, C, F, 128), jnp.float32)],
        compiler_params=pltpu.CompilerParams(
            dimension_semantics=("parallel", "arbitrary"),
            vmem_limit_bytes=vmem_limit),
    )(x, w2, b2)
    return out.reshape(B, C)


def reference(x, w, b):
    x_mean = jnp.mean(x, axis=-1)                                  # (B, C, F)
    logits = jnp.einsum("oc,bcf->bof", w, x_mean) + b[None, :, :]  # (B, 1, F)
    att = jax.nn.softmax(jax.nn.sigmoid(logits), axis=-1)          # (B, 1, F)
    return jnp.sum(x_mean * att, axis=-1)                          # (B, C)


if __name__ == "__main__":
    B, C, F, T = 2, 4, 16, 16
    key = jax.random.PRNGKey(0)
    kx, kw, kb = jax.random.split(key, 3)

    x = jax.random.normal(kx, (B, C, F, T), dtype=jnp.float32)
    # Conv1d(in_channels=C, out_channels=1, kernel_size=1) parameters
    # (weight (1, C, 1) squeezed to (1, C)), deterministically initialized.
    w = jax.random.normal(kw, (1, C), dtype=jnp.float32) * 0.1
    b = jax.random.normal(kb, (1, 1), dtype=jnp.float32) * 0.1

    out = frequency_attentive_pooling(x, w, b)
    out = jax.block_until_ready(out)

    ref = reference(x, w, b)
    assert out.shape == (B, C), out.shape
    assert jnp.allclose(out, ref, atol=1e-5, rtol=1e-5), (out, ref)

    print("KERNEL_OK")
</pallas_src>

<mosaic_0001>
module attributes {stable_mosaic.version = 11 : i64} {
  func.func @fap_kernel(%arg0: i32, %arg1: i32, %arg2: memref<2x4x16x16xf32, #tpu.memory_space<vmem>>, %arg3: memref<4x1xf32, #tpu.memory_space<vmem>>, %arg4: memref<1x1xf32, #tpu.memory_space<smem>>, %arg5: memref<1x2x4xf32, #tpu.memory_space<vmem>>, %arg6: memref<2x4x16x128xf32, #tpu.memory_space<vmem>>) attributes {dimension_semantics = [#tpu.dimension_semantics<parallel>, #tpu.dimension_semantics<arbitrary>], iteration_bounds = array<i64: 1, 1>, scalar_prefetch = 0 : i64, scratch_operands = 1 : i64, tpu.core_type = #tpu.core_type<tc>, window_params = [{transform_indices = @transform_0, window_bounds = array<i64: 2, 4, 16, 16>}, {pipeline_mode = #tpu.pipeline_mode<synchronous>, transform_indices = @transform_1, window_bounds = array<i64: 4, 1>}, {transform_indices = @transform_2, window_bounds = array<i64: 1, 1>}, {transform_indices = @transform_3, window_bounds = array<i64: 1, 2, 4>}]} {
    %c0_i32 = arith.constant 0 : i32
    %0 = arith.cmpi eq, %arg1, %c0_i32 : i32
    %1 = arith.extui %0 : i1 to i32
    %c0_i32_0 = arith.constant 0 : i32
    %2 = arith.cmpi ne, %1, %c0_i32_0 : i32
    scf.if %2 {
      %cst = arith.constant 0.000000e+00 : f32
      %10 = vector.broadcast %cst : f32 to vector<2x4x16x128xf32>
      %c0_14 = arith.constant 0 : index
      %c0_15 = arith.constant 0 : index
      %c0_16 = arith.constant 0 : index
      %c0_17 = arith.constant 0 : index
      %11 = vector.load %arg6[%c0_14, %c0_15, %c0_16, %c0_17] : memref<2x4x16x128xf32, #tpu.memory_space<vmem>>, vector<2x4x16x128xf32>
      tpu.vector_store %arg6[%c0_14, %c0_15, %c0_16, %c0_17], %10 {strides = array<i32>} : memref<2x4x16x128xf32, #tpu.memory_space<vmem>>, vector<2x4x16x128xf32>,
    } else {
    }
    %c0 = arith.constant 0 : index
    %c0_1 = arith.constant 0 : index
    %c0_2 = arith.constant 0 : index
    %c0_3 = arith.constant 0 : index
    %3 = vector.load %arg6[%c0, %c0_1, %c0_2, %c0_3] : memref<2x4x16x128xf32, #tpu.memory_space<vmem>>, vector<2x4x16x16xf32>
    %c0_4 = arith.constant 0 : index
    %c0_5 = arith.constant 0 : index
    %c0_6 = arith.constant 0 : index
    %c0_7 = arith.constant 0 : index
    %4 = vector.load %arg2[%c0_4, %c0_5, %c0_6, %c0_7] : memref<2x4x16x16xf32, #tpu.memory_space<vmem>>, vector<2x4x16x16xf32>
    %5 = arith.addf %3, %4 : vector<2x4x16x16xf32>
    %c0_8 = arith.constant 0 : index
    %c0_9 = arith.constant 0 : index
    %c0_10 = arith.constant 0 : index
    %c0_11 = arith.constant 0 : index
    %6 = vector.load %arg6[%c0_8, %c0_9, %c0_10, %c0_11] : memref<2x4x16x128xf32, #tpu.memory_space<vmem>>, vector<2x4x16x16xf32>
    tpu.vector_store %arg6[%c0_8, %c0_9, %c0_10, %c0_11], %5 {strides = array<i32>} : memref<2x4x16x128xf32, #tpu.memory_space<vmem>>, vector<2x4x16x16xf32>,
    %c0_i32_12 = arith.constant 0 : i32
    %7 = arith.cmpi eq, %arg1, %c0_i32_12 : i32
    %8 = arith.extui %7 : i1 to i32
    %c0_i32_13 = arith.constant 0 : i32
    %9 = arith.cmpi ne, %8, %c0_i32_13 : i32
    scf.if %9 {
      %c0_14 = arith.constant 0 : index
      %c0_15 = arith.constant 0 : index
      %c0_16 = arith.constant 0 : index
      %c0_17 = arith.constant 0 : index
      %10 = vector.load %arg6[%c0_14, %c0_15, %c0_16, %c0_17] : memref<2x4x16x128xf32, #tpu.memory_space<vmem>>, vector<2x4x16x128xf32>
      %cst = arith.constant dense<0.000000e+00> : vector<2x4x16xf32>
      %11 = vector.multi_reduction <add>, %10, %cst [3] : vector<2x4x16x128xf32> to vector<2x4x16xf32>
      %cst_18 = arith.constant 6.250000e-02 : f32
      %12 = vector.broadcast %cst_18 : f32 to vector<2x4x16xf32>
      %13 = arith.mulf %11, %12 : vector<2x4x16xf32>
      %c0_19 = arith.constant 0 : index
      %c0_20 = arith.constant 0 : index
      %14 = vector.load %arg3[%c0_19, %c0_20] : memref<4x1xf32, #tpu.memory_space<vmem>>, vector<4x1xf32>
      %15 = vector.shape_cast %14 : vector<4x1xf32> to vector<1x4x1xf32>
      %16 = vector.broadcast %15 : vector<1x4x1xf32> to vector<2x4x16xf32>
      %17 = arith.mulf %16, %13 : vector<2x4x16xf32>
      %cst_21 = arith.constant dense<0.000000e+00> : vector<2x16xf32>
      %18 = vector.multi_reduction <add>, %17, %cst_21 [1] : vector<2x4x16xf32> to vector<2x16xf32>
      %c0_22 = arith.constant 0 : index
      %c0_23 = arith.constant 0 : index
      %19 = memref.load %arg4[%c0_22, %c0_23] : memref<1x1xf32, #tpu.memory_space<smem>>
      %20 = vector.broadcast %19 : f32 to vector<2x16xf32>
      %21 = arith.addf %18, %20 : vector<2x16xf32>
      %cst_24 = arith.constant 0.000000e+00 : f32
      %22 = vector.broadcast %cst_24 : f32 to vector<2x16xf32>
      %23 = arith.subf %22, %21 : vector<2x16xf32>
      %24 = math.exp %23 : vector<2x16xf32>
      %cst_25 = arith.constant 1.000000e+00 : f32
      %25 = vector.broadcast %cst_25 : f32 to vector<2x16xf32>
      %26 = arith.addf %25, %24 : vector<2x16xf32>
      %cst_26 = arith.constant 1.000000e+00 : f32
      %27 = vector.broadcast %cst_26 : f32 to vector<2x16xf32>
      %28 = arith.divf %27, %26 : vector<2x16xf32>
      %cst_27 = arith.constant dense<0xFF800000> : vector<2xf32>
      %29 = vector.multi_reduction <maximumf>, %28, %cst_27 [1] : vector<2x16xf32> to vector<2xf32>
      %30 = vector.shape_cast %29 : vector<2xf32> to vector<2x1xf32>
      %31 = vector.broadcast %30 : vector<2x1xf32> to vector<2x16xf32>
      %32 = arith.subf %28, %31 : vector<2x16xf32>
      %33 = math.exp %32 : vector<2x16xf32>
      %cst_28 = arith.constant dense<0.000000e+00> : vector<2xf32>
      %34 = vector.multi_reduction <add>, %33, %cst_28 [1] : vector<2x16xf32> to vector<2xf32>
      %35 = vector.shape_cast %34 : vector<2xf32> to vector<2x1xf32>
      %36 = vector.broadcast %35 : vector<2x1xf32> to vector<2x16xf32>
      %37 = arith.divf %33, %36 : vector<2x16xf32>
      %38 = vector.shape_cast %37 : vector<2x16xf32> to vector<2x1x16xf32>
      %39 = vector.broadcast %38 : vector<2x1x16xf32> to vector<2x4x16xf32>
      %40 = arith.mulf %13, %39 : vector<2x4x16xf32>
      %cst_29 = arith.constant dense<0.000000e+00> : vector<2x4xf32>
      %41 = vector.multi_reduction <add>, %40, %cst_29 [2] : vector<2x4x16xf32> to vector<2x4xf32>
      %42 = vector.shape_cast %41 : vector<2x4xf32> to vector<1x2x4xf32>
      %c0_30 = arith.constant 0 : index
      %c0_31 = arith.constant 0 : index
      %c0_32 = arith.constant 0 : index
      %43 = vector.load %arg5[%c0_30, %c0_31, %c0_32] : memref<1x2x4xf32, #tpu.memory_space<vmem>>, vector<1x2x4xf32>
      tpu.vector_store %arg5[%c0_30, %c0_31, %c0_32], %42 {strides = array<i32>} : memref<1x2x4xf32, #tpu.memory_space<vmem>>, vector<1x2x4xf32>,
    } else {
    }
    return
  }
  func.func @transform_0(%arg0: i32, %arg1: i32) -> (i32, i32, i32, i32) {
    %c0_i32 = arith.constant 0 : i32
    %c0_i32_0 = arith.constant 0 : i32
    %c0_i32_1 = arith.constant 0 : i32
    return %arg0, %c0_i32, %c0_i32_0, %arg1 : i32, i32, i32, i32
  }
  func.func @transform_1(%arg0: i32, %arg1: i32) -> (i32, i32) {
    %c0_i32 = arith.constant 0 : i32
    %c0_i32_0 = arith.constant 0 : i32
    %c0_i32_1 = arith.constant 0 : i32
    return %c0_i32, %c0_i32_0 : i32, i32
  }
  func.func @transform_2(%arg0: i32, %arg1: i32) -> (i32, i32) {
    %c0_i32 = arith.constant 0 : i32
    %c0_i32_0 = arith.constant 0 : i32
    %c0_i32_1 = arith.constant 0 : i32
    return %c0_i32, %c0_i32_0 : i32, i32
  }
  func.func @transform_3(%arg0: i32, %arg1: i32) -> (i32, i32, i32) {
    %c0_i32 = arith.constant 0 : i32
    %c0_i32_0 = arith.constant 0 : i32
    %c0_i32_1 = arith.constant 0 : i32
    return %arg0, %c0_i32, %c0_i32_0 : i32, i32, i32
  }
}

</mosaic_0001>

<bundles_post_ra>
// kernel: tpu_custom_call.1
= control target key start
LH: loop header
LB: loop body
LE: loop exit
PB: predicated region body
PF: predicated region fallthrough
CT: control target
= control target key end

     0   :  { %9 = vsyncpa [#allocation5], 0  ;;  %s869_s0 = inlined_call_operand.hbm [shape: f32[2,4,16,16], index: 0, kind: input, shape index: {}]   ;;  %s870_s1 = inlined_call_operand.vmem [shape: f32[4,1], index: 1, kind: input, shape index: {}]   ;;  %s871_s2 = inlined_call_operand.<no memory space> [shape: f32[1,1], index: 2, kind: input, shape index: {}]   ;;  %s872_s3 = inlined_call_operand.hbm [shape: f32[1,2,4], index: 3, kind: output, shape index: {}]  }
   0x1   :  { %10 = vsyncpa [#allocation6], 0  ;;  %s653_s12 = smov [#allocation4]   ;;  %s605_s16 = scalar_lea.hbm %s869_s0, 2048 }
   0x2   :  { %s16_s13 = sshll.u32 %s653_s12, 4  ;;  %p606_p0 = scmp.ne.s32.totalorder %s869_s0, %s605_s16  ;;  %s17_s13 = int_to_ptr.vmem [resolvable:$true] %s16_s13 }
   0x3   :  { %p609_p1 = scmp.lt.u32.totalorder %s605_s16, %s869_s0 }
   0x5   :  { %p611_p2 = pnand %p609_p1, %p606_p0 }
   0x7   :  { %614 = shalt.err (!%p611_p2)
}
   0x8   :  { %s615_s21 = scalar_lea.vmem %s17_s13, 2048  ;;  %p620_p4 = scmp.lt.s32.totalorder %s17_s13, %s17_s13 }
   0x9   :  { %p616_p3 = scmp.ne.s32.totalorder %s17_s13, %s615_s21  ;;  %p621_p5 = scmp.lt.s32.totalorder %s615_s21, %s615_s21 }
   0xb   :  { %p622_p6 = por %p621_p5, %p620_p4 }
   0xd   :  { %p623_p7 = pnand %p622_p6, %p616_p3 }
   0xf   :  { %626 = shalt.err (!%p623_p7)
}
  0x10   :  { %s654_s22 = smov 128   ;;  %s655_s23 = smov 8  }
  0x11   :  { %22 = dma.hbm_to_vmem [thread:$0]  %s869_s0, 2048, %s17_s13, [#allocation5], %s654_s22, %s654_s22, %s655_s23  }
  0x12   :  { %649 = dma.done.wait [#allocation5], 2048  }
  0x13   :  { %650 = vsyncadd [#allocation5], 4294965248  ;;  %v656_v0 = vmov 0.0   ;;  %v657_v1 = vmov 0   ;;  %v68_v2 = vld [vmem:[#allocation4 + $0x10] sm:$0xff]  ;;  %vm98_vm0 = vcmask 130048   ;;  %v204_v41 = vlaneseq }
  0x14   :  { %36 = vst [vmem:[#allocation2 + $0x10] sm:$0xff] %v656_v0  ;;  %34 = vst [vmem:[#allocation2] sm:$0xff] %v656_v0  ;;  %587 = vset.pattern.permute.xlu0 %v657_v1  ;;  %588 = vset.pattern.permute.xlu1 %v657_v1  ;;  %v66_v3 = vld [vmem:[#allocation4] sm:$0xff]  ;;  %v69_v4 = vld [vmem:[#allocation4 + $0x18] sm:$0xff]  ;;  %vm215_vm1 = vcmask 130112   ;;  %vm280_vm2 = vcmask 1041409  }
  0x15   :  { %35 = vst [vmem:[#allocation2 + $0x8] sm:$0xff] %v656_v0  ;;  %37 = vst [vmem:[#allocation2 + $0x18] sm:$0xff] %v656_v0  ;;  %v67_v5 = vld [vmem:[#allocation4 + $0x8] sm:$0xff]  ;;  %v74_v7 = vld [vmem:[#allocation4 + $0x40] sm:$0xff]  ;;  %v205_v44 = vand.u32 127, %v204_v41  ;;  %v710_v47 = vshrl.u32 %v204_v41, 7 }
  0x16   :  { %38 = vst [vmem:[#allocation2 + $0x20] sm:$0xff] %v656_v0  ;;  %39 = vst [vmem:[#allocation2 + $0x28] sm:$0xff] %v656_v0  ;;  %v75_v6 = vld [vmem:[#allocation4 + $0x48] sm:$0xff]  ;;  %v77_v8 = vld [vmem:[#allocation4 + $0x58] sm:$0xff]  ;;  %vm282_vm3 = vcmask 1042434   ;;  %vm284_vm4 = vcmask 1043459  }
  0x17   :  { %40 = vst [vmem:[#allocation2 + $0x30] sm:$0xff] %v656_v0  ;;  %41 = vst [vmem:[#allocation2 + $0x38] sm:$0xff] %v656_v0  ;;  %v76_v9 = vld [vmem:[#allocation4 + $0x50] sm:$0xff]  ;;  %v71_v10 = vld [vmem:[#allocation4 + $0x28] sm:$0xff]  ;;  %v210_v48 = vadd.s32 4294967288, %v205_v44  ;;  %v713_v51 = vsub.s32 %v205_v44, %v710_v47  ;;  %vm293_vm5 = vcmask 125952  }
  0x18   :  { %42 = vst [vmem:[#allocation2 + $0x40] sm:$0xff] %v656_v0  ;;  %43 = vst [vmem:[#allocation2 + $0x48] sm:$0xff] %v656_v0  ;;  %v70_v11 = vld [vmem:[#allocation4 + $0x20] sm:$0xff]  ;;  %v79_v12 = vld [vmem:[#allocation4 + $0x68] sm:$0xff]  ;;  %vm328_vm6 = vcmask 123904   ;;  %vm564_vm7 = vcmask 25600  }
  0x19   :  { %44 = vst [vmem:[#allocation2 + $0x50] sm:$0xff] %v656_v0  ;;  %45 = vst [vmem:[#allocation2 + $0x58] sm:$0xff] %v656_v0  ;;  %v78_v13 = vld [vmem:[#allocation4 + $0x60] sm:$0xff]  ;;  %v73_v14 = vld [vmem:[#allocation4 + $0x38] sm:$0xff]  ;;  %v716_v52 = vsub.s32 %v210_v48, %v710_v47 }
  0x1a   :  { %46 = vst [vmem:[#allocation2 + $0x60] sm:$0xff] %v656_v0  ;;  %47 = vst [vmem:[#allocation2 + $0x68] sm:$0xff] %v656_v0  ;;  %v72_v15 = vld [vmem:[#allocation4 + $0x30] sm:$0xff]  ;;  %v81_v16 = vld [vmem:[#allocation4 + $0x78] sm:$0xff] }
  0x1b   :  { %48 = vst [vmem:[#allocation2 + $0x70] sm:$0xff] %v656_v0  ;;  %49 = vst [vmem:[#allocation2 + $0x78] sm:$0xff] %v656_v0  ;;  %v80_v17 = vld [vmem:[#allocation4 + $0x70] sm:$0xff]  ;;  %v182_v34 = vld [vmem:[%s870_s1] sm:$0xf] }
  0x1c   :  { %101 = vst.msk [vmem:[#allocation2 + $0x10] sm:$0xff] %vm98_vm0, %v68_v2  ;;  %99 = vst.msk [vmem:[#allocation2] sm:$0xff] %vm98_vm0, %v66_v3 }
  0x1d   :  { %102 = vst.msk [vmem:[#allocation2 + $0x18] sm:$0xff] %vm98_vm0, %v69_v4  ;;  %100 = vst.msk [vmem:[#allocation2 + $0x8] sm:$0xff] %vm98_vm0, %v67_v5 }
  0x1e   :  { %108 = vst.msk [vmem:[#allocation2 + $0x48] sm:$0xff] %vm98_vm0, %v75_v6  ;;  %107 = vst.msk [vmem:[#allocation2 + $0x40] sm:$0xff] %vm98_vm0, %v74_v7 }
  0x1f   :  { %110 = vst.msk [vmem:[#allocation2 + $0x58] sm:$0xff] %vm98_vm0, %v77_v8  ;;  %109 = vst.msk [vmem:[#allocation2 + $0x50] sm:$0xff] %vm98_vm0, %v76_v9 }
  0x20   :  { %104 = vst.msk [vmem:[#allocation2 + $0x28] sm:$0xff] %vm98_vm0, %v71_v10  ;;  %103 = vst.msk [vmem:[#allocation2 + $0x20] sm:$0xff] %vm98_vm0, %v70_v11 }
  0x21   :  { %112 = vst.msk [vmem:[#allocation2 + $0x68] sm:$0xff] %vm98_vm0, %v79_v12  ;;  %111 = vst.msk [vmem:[#allocation2 + $0x60] sm:$0xff] %vm98_vm0, %v78_v13 }
  0x22   :  { %106 = vst.msk [vmem:[#allocation2 + $0x38] sm:$0xff] %vm98_vm0, %v73_v14  ;;  %105 = vst.msk [vmem:[#allocation2 + $0x30] sm:$0xff] %vm98_vm0, %v72_v15 }
  0x23   :  { %114 = vst.msk [vmem:[#allocation2 + $0x78] sm:$0xff] %vm98_vm0, %v81_v16  ;;  %113 = vst.msk [vmem:[#allocation2 + $0x70] sm:$0xff] %vm98_vm0, %v80_v17  ;;  %v120_v18 = vld [vmem:[#allocation2 + $0x10] sm:$0xff]  ;;  %v118_v19 = vld [vmem:[#allocation2] sm:$0xff] }
  0x24   :  { %138 = vadd.xlane.f32.xlu1 %v120_v18  ;;  %134 = vadd.xlane.f32.xlu0 %v118_v19  ;;  %v121_v20 = vld [vmem:[#allocation2 + $0x18] sm:$0xff]  ;;  %v119_v21 = vld [vmem:[#allocation2 + $0x8] sm:$0xff] }
  0x25   :  { %v127_v22 = vld [vmem:[#allocation2 + $0x48] sm:$0xff]  ;;  %v126_v23 = vld [vmem:[#allocation2 + $0x40] sm:$0xff] }
  0x26   :  { %v129_v24 = vld [vmem:[#allocation2 + $0x58] sm:$0xff]  ;;  %v128_v25 = vld [vmem:[#allocation2 + $0x50] sm:$0xff] }
  0x27   :  { %v123_v26 = vld [vmem:[#allocation2 + $0x28] sm:$0xff]  ;;  %v122_v27 = vld [vmem:[#allocation2 + $0x20] sm:$0xff] }
  0x28   :  { %140 = vadd.xlane.f32.xlu1 %v121_v20  ;;  %136 = vadd.xlane.f32.xlu0 %v119_v21  ;;  %v131_v28 = vld [vmem:[#allocation2 + $0x68] sm:$0xff]  ;;  %v130_v29 = vld [vmem:[#allocation2 + $0x60] sm:$0xff] }
  0x29   :  { %v125_v30 = vld [vmem:[#allocation2 + $0x38] sm:$0xff]  ;;  %v124_v31 = vld [vmem:[#allocation2 + $0x30] sm:$0xff] }
  0x2a   :  { %v133_v32 = vld [vmem:[#allocation2 + $0x78] sm:$0xff]  ;;  %v132_v33 = vld [vmem:[#allocation2 + $0x70] sm:$0xff] }
  0x2c   :  { %152 = vadd.xlane.f32.xlu1 %v127_v22  ;;  %150 = vadd.xlane.f32.xlu0 %v126_v23 }
  0x30   :  { %156 = vadd.xlane.f32.xlu1 %v129_v24  ;;  %154 = vadd.xlane.f32.xlu0 %v128_v25 }
  0x34   :  { %144 = vadd.xlane.f32.xlu1 %v123_v26  ;;  %142 = vadd.xlane.f32.xlu0 %v122_v27 }
  0x38   :  { %160 = vadd.xlane.f32.xlu1 %v131_v28  ;;  %158 = vadd.xlane.f32.xlu0 %v130_v29 }
  0x3c   :  { %148 = vadd.xlane.f32.xlu1 %v125_v30  ;;  %146 = vadd.xlane.f32.xlu0 %v124_v31 }
  0x40   :  { %164 = vadd.xlane.f32.xlu1 %v133_v32  ;;  %162 = vadd.xlane.f32.xlu0 %v132_v33 }
  0x56   :  { %185 = vperm.xlu0 %587, %v182_v34  }
  0xb1   :  { %v139_v35 = vpop.xlane.xlu1 %138  ;;  %v135_v36 = vpop.xlane.xlu0 %134 }
  0xb2   :  { %v718_v53 = vmul.f32 0.0625, %v139_v35  ;;  %v720_v54 = vmul.f32 0.0625, %v135_v36 }
  0xb4   :  { %v220_v5 = vrot.slane %v718_v53, %v713_v51  ;;  %v209_v6 = vrot.slane %v720_v54, %v713_v51 }
  0xb5   :  { %v141_v37 = vpop.xlane.xlu1 %140  ;;  %v137_v38 = vpop.xlane.xlu0 %136 }
  0xb6   :  { %v722_v55 = vmul.f32 0.0625, %v141_v37  ;;  %v724_v56 = vmul.f32 0.0625, %v137_v38 }
  0xb8   :  { %v224_v7 = vrot.slane %v722_v55, %v716_v52  ;;  %v214_v8 = vrot.slane %v724_v56, %v716_v52 }
  0xb9   :  { %v153_v39 = vpop.xlane.xlu1 %152  ;;  %v151_v40 = vpop.xlane.xlu0 %150 }
  0xba   :  { %v726_v57 = vmul.f32 0.0625, %v153_v39  ;;  %v728_v58 = vmul.f32 0.0625, %v151_v40  ;;  %v225_v23 = vsel %vm215_vm1, %v224_v7, %v220_v5  ;;  %v216_v24 = vsel %vm215_vm1, %v214_v8, %v209_v6 }
  0xbb   :  { %v281_v33 = vsel %vm280_vm2, %v225_v23, %v216_v24  ;;  %v309_v7 = vstv %s871_s2  ;;  %s658_s2 = smov [#allocation7]  }
  0xbc   :  { %v251_v9 = vrot.slane %v726_v57, %v716_v52  ;;  %v247_v10 = vrot.slane %v728_v58, %v713_v51  ;;  %s572_s28 = sshll.u32 %s658_s2, 4  ;;  %s573_s28 = int_to_ptr.vmem [resolvable:$true] %s572_s28 }
  0xbd   :  { %v157_v42 = vpop.xlane.xlu1 %156  ;;  %v155_v43 = vpop.xlane.xlu0 %154  ;;  %s627_s29 = scalar_lea.vmem %s573_s28, 32  ;;  %p632_p9 = scmp.lt.s32.totalorder %s573_s28, %s573_s28 }
  0xbe   :  { %v730_v59 = vmul.f32 0.0625, %v157_v42  ;;  %v732_v60 = vmul.f32 0.0625, %v155_v43  ;;  %v252_v30 = vsel %vm215_vm1, %v251_v9, %v247_v10  ;;  %p628_p8 = scmp.ne.s32.totalorder %s573_s28, %s627_s29  ;;  %p633_p10 = scmp.lt.s32.totalorder %s627_s29, %s627_s29 }
  0xc0   :  { %v260_v11 = vrot.slane %v730_v59, %v716_v52  ;;  %v256_v12 = vrot.slane %v732_v60, %v713_v51  ;;  %p634_p11 = por %p633_p10, %p632_p9 }
  0xc1   :  { %v145_v45 = vpop.xlane.xlu1 %144  ;;  %v143_v46 = vpop.xlane.xlu0 %142 }
  0xc2   :  { %v734_v61 = vmul.f32 0.0625, %v145_v45  ;;  %v736_v62 = vmul.f32 0.0625, %v143_v46  ;;  %v261_v25 = vsel %vm215_vm1, %v260_v11, %v256_v12  ;;  %p635_p12 = pnand %p634_p11, %p628_p8 }
  0xc3   :  { %v286_v34 = vsel %vm280_vm2, %v261_v25, %v252_v30 }
  0xc4   :  { %v233_v13 = vrot.slane %v734_v61, %v716_v52  ;;  %v229_v14 = vrot.slane %v736_v62, %v713_v51 }
  0xc5   :  { %v161_v49 = vpop.xlane.xlu1 %160  ;;  %v159_v50 = vpop.xlane.xlu0 %158 }
  0xc6   :  { %v738_v63 = vmul.f32 0.0625, %v161_v49  ;;  %v740_v0 = vmul.f32 0.0625, %v159_v50  ;;  %v234_v28 = vsel %vm215_vm1, %v233_v13, %v229_v14 }
  0xc7   :  { %v283_v35 = vsel %vm282_vm3, %v234_v28, %v281_v33 }
  0xc8   :  { %v269_v15 = vrot.slane %v738_v63, %v716_v52  ;;  %v265_v16 = vrot.slane %v740_v0, %v713_v51 }
  0xc9   :  { %v149_v1 = vpop.xlane.xlu1 %148  ;;  %v147_v2 = vpop.xlane.xlu0 %146 }
  0xca   :  { %v742_v3 = vmul.f32 0.0625, %v149_v1  ;;  %v744_v4 = vmul.f32 0.0625, %v147_v2  ;;  %v270_v29 = vsel %vm215_vm1, %v269_v15, %v265_v16 }
  0xcb   :  { %v287_v36 = vsel %vm282_vm3, %v270_v29, %v286_v34 }
  0xcc   :  { %v242_v19 = vrot.slane %v742_v3, %v716_v52  ;;  %v238_v20 = vrot.slane %v744_v4, %v713_v51 }
  0xcd   :  { %v165_v17 = vpop.xlane.xlu1 %164  ;;  %v163_v18 = vpop.xlane.xlu0 %162 }
  0xce   :  { %v774_v21 = vmul.f32 0.0625, %v165_v17  ;;  %v776_v22 = vmul.f32 0.0625, %v163_v18  ;;  %v243_v31 = vsel %vm215_vm1, %v242_v19, %v238_v20 }
  0xcf   :  { %v285_v37 = vsel %vm284_vm4, %v243_v31, %v283_v35 }
  0xd0   :  { %v278_v26 = vrot.slane %v774_v21, %v716_v52  ;;  %v274_v27 = vrot.slane %v776_v22, %v713_v51 }
  0xd2   :  { %v279_v32 = vsel %vm215_vm1, %v278_v26, %v274_v27 }
  0xd3   :  { %v288_v38 = vsel %vm284_vm4, %v279_v32, %v287_v36 }
  0xd5   :  { %v186_v39 = vpop.permute.xlu0 %185 }
  0xd6   :  { %v291_v40 = vmul.f32 %v285_v37, %v186_v39  ;;  %v292_v41 = vmul.f32 %v288_v38, %v186_v39  ;;  %v360_v39 = vsub.s32 0, %v710_v47 }
  0xd8   :  { %v294_v42 = vsel %vm293_vm5, %v291_v40, 0.0  ;;  %v301_v43 = vsel %vm293_vm5, %v292_v41, 0.0 }
  0xd9   :  { %v295_v44 = vrot.slane %v294_v42, 4  ;;  %v302_v45 = vrot.slane %v301_v43, 4 }
  0xdb   :  { %v296_v46 = vadd.f32 %v295_v44, %v294_v42  ;;  %v303_v48 = vadd.f32 %v302_v45, %v301_v43 }
  0xdd   :  { %v297_v49 = vrot.slane %v296_v46, 2  ;;  %v304_v50 = vrot.slane %v303_v48, 2 }
  0xdf   :  { %v298_v1 = vadd.f32 %v297_v49, %v296_v46  ;;  %v305_v2 = vadd.f32 %v304_v50, %v303_v48 }
  0xe1   :  { %v299_v5 = vrot.slane %v298_v1, 1  ;;  %v306_v6 = vrot.slane %v305_v2, 1 }
  0xe3   :  { %v300_v8 = vadd.f32 %v299_v5, %v298_v1  ;;  %v307_v9 = vadd.f32 %v306_v6, %v305_v2 }
  0xe5   :  { %v310_v10 = vadd.f32 %v309_v7, %v300_v8  ;;  %v311_v11 = vadd.f32 %v309_v7, %v307_v9 }
  0xe7   :  { %v312_v12 = vsub.f32 0.0, %v310_v10  ;;  %v313_v13 = vsub.f32 0.0, %v311_v11 }
  0xe9   :  { %v314_v14 = vmul.f32 1.442695, %v312_v12  ;;  %v316_v15 = vmul.f32 1.442695, %v313_v13 }
  0xeb   :  { %589 = vpow2.f32 %v314_v14 }
  0xec   :  { %591 = vpow2.f32 %v316_v15 }
  0xf5   :  { %v590_v16 = vpop.eup %589 }
  0xf6   :  { %v592_v17 = vpop.eup %591  ;;  %v318_v18 = vadd.f32 1.0, %v590_v16 }
  0xf7   :  { %v319_v19 = vadd.f32 1.0, %v592_v17 }
  0xf8   :  { %593 = vrcp.f32 %v318_v18 }
  0xf9   :  { %595 = vrcp.f32 %v319_v19 }
 0x102   :  { %v594_v20 = vpop.eup %593 }
 0x103   :  { %v596_v23 = vpop.eup %595 }
 0x104   :  { %v326_v24 = vsel %vm280_vm2, %v596_v23, %v594_v20 }
 0x105   :  { %v329_v25 = vsel %vm328_vm6, %v326_v24, -inf }
 0x106   :  { %330 = vmax.xlane.f32.xlu1 %v329_v25 }
 0x193   :  { %v331_v26 = vpop.xlane.xlu1 %330 }
 0x194   :  { %v333_v27 = vrot.slane %v331_v26, 1  ;;  %v336_v28 = vsub.f32 %v594_v20, %v331_v26 }
 0x196   :  { %v337_v29 = vsub.f32 %v596_v23, %v333_v27  ;;  %v338_v30 = vmul.f32 1.442695, %v336_v28 }
 0x198   :  { %v340_v31 = vmul.f32 1.442695, %v337_v29 }
 0x19a   :  { %597 = vpow2.f32 %v340_v31 }
 0x19b   :  { %599 = vpow2.f32 %v338_v30 }
 0x1a4   :  { %v598_v32 = vpop.eup %597 }
 0x1a5   :  { %v344_v33 = vrot.slane %v598_v32, 7  ;;  %v600_v34 = vpop.eup %599 }
 0x1a7   :  { %v345_v35 = vsel %vm280_vm2, %v344_v33, %v600_v34 }
 0x1a8   :  { %v347_v36 = vsel %vm328_vm6, %v345_v35, 0.0 }
 0x1a9   :  { %348 = vadd.xlane.f32.xlu1 %v347_v36 }
 0x236   :  { %v349_v37 = vpop.xlane.xlu1 %348 }
 0x237   :  { %v351_v38 = vrot.slane %v349_v37, 1  ;;  %601 = vrcp.f32 %v349_v37 }
 0x239   :  { %603 = vrcp.f32 %v351_v38 }
 0x241   :  { %v602_v40 = vpop.eup %601 }
 0x242   :  { %v355_v41 = vmul.f32 %v602_v40, %v600_v34 }
 0x243   :  { %v604_v43 = vpop.eup %603 }
 0x244   :  { %v361_v42 = vrot.slane %v355_v41, %v360_v39  ;;  %v357_v44 = vmul.f32 %v604_v43, %v598_v32 }
 0x246   :  { %369 = vbcast.lane.b32.xlu1 %v361_v42, 256  ;;  %v365_v45 = vrot.slane %v357_v44, %v360_v39 }
 0x24a   :  { %373 = vbcast.lane.b32.xlu1 %v361_v42, 264 }
 0x24e   :  { %376 = vbcast.lane.b32.xlu1 %v365_v45, 256 }
 0x252   :  { %380 = vbcast.lane.b32.xlu1 %v365_v45, 264 }
 0x2b8   :  { %v370_v46 = vpop.permute.xlu1 %369 }
 0x2b9   :  { %v388_v48 = vmul.f32 %v370_v46, %v718_v53  ;;  %v386_v49 = vmul.f32 %v370_v46, %v720_v54  ;;  %v390_v47 = vmul.f32 %v370_v46, %v736_v62  ;;  %v392_v2 = vmul.f32 %v370_v46, %v744_v4 }
 0x2bb   :  { %425 = vperm.xlu0 %587, %v388_v48   ;;  %419 = vperm.xlu1 %588, %v386_v49  }
 0x2bc   :  { %v374_v50 = vpop.permute.xlu1 %373 }
 0x2bd   :  { %v387_v1 = vmul.f32 %v374_v50, %v724_v56  ;;  %v389_v5 = vmul.f32 %v374_v50, %v722_v55  ;;  %v391_v53 = vmul.f32 %v374_v50, %v734_v61  ;;  %v393_v7 = vmul.f32 %v374_v50, %v742_v3 }
 0x2bf   :  { %431 = vperm.xlu0 %587, %v390_v47   ;;  %422 = vperm.xlu1 %588, %v387_v1  }
 0x2c0   :  { %v377_v6 = vpop.permute.xlu1 %376 }
 0x2c1   :  { %v394_v54 = vmul.f32 %v377_v6, %v728_v58  ;;  %v396_v62 = vmul.f32 %v377_v6, %v732_v60  ;;  %v398_v4 = vmul.f32 %v377_v6, %v740_v0  ;;  %v400_v8 = vmul.f32 %v377_v6, %v776_v22 }
 0x2c3   :  { %437 = vperm.xlu0 %587, %v392_v2   ;;  %428 = vperm.xlu1 %588, %v389_v5  }
 0x2c4   :  { %v381_v56 = vpop.permute.xlu1 %380 }
 0x2c5   :  { %v395_v55 = vmul.f32 %v381_v56, %v726_v57  ;;  %v397_v61 = vmul.f32 %v381_v56, %v730_v59  ;;  %v399_v58 = vmul.f32 %v381_v56, %v738_v63  ;;  %v401_v60 = vmul.f32 %v381_v56, %v774_v21 }
 0x2c7   :  { %434 = vperm.xlu1 %588, %v391_v53   ;;  %443 = vperm.xlu0 %587, %v394_v54  }
 0x2cb   :  { %440 = vperm.xlu1 %588, %v393_v7   ;;  %449 = vperm.xlu0 %587, %v396_v62  }
 0x2cf   :  { %455 = vperm.xlu0 %587, %v398_v4   ;;  %446 = vperm.xlu1 %588, %v395_v55  }
 0x2d3   :  { %461 = vperm.xlu0 %587, %v400_v8   ;;  %452 = vperm.xlu1 %588, %v397_v61  }
 0x2d7   :  { %458 = vperm.xlu1 %588, %v399_v58  }
 0x2db   :  { %464 = vperm.xlu1 %588, %v401_v60  }
 0x33a   :  { %v426_v3 = vpop.permute.xlu0 %425  ;;  %v420_v9 = vpop.permute.xlu1 %419 }
 0x33b   :  { %v478_v59 = vrot.slane %v426_v3, %v713_v51  ;;  %v469_v21 = vrot.slane %v420_v9, %v713_v51 }
 0x33e   :  { %v432_v10 = vpop.permute.xlu0 %431  ;;  %v423_v0 = vpop.permute.xlu1 %422 }
 0x33f   :  { %v473_v14 = vrot.slane %v423_v0, %v716_v52  ;;  %v487_v15 = vrot.slane %v432_v10, %v713_v51 }
 0x341   :  { %v474_v19 = vsel %vm215_vm1, %v473_v14, %v469_v21 }
 0x342   :  { %v438_v11 = vpop.permute.xlu0 %437  ;;  %v429_v57 = vpop.permute.xlu1 %428 }
 0x343   :  { %v482_v12 = vrot.slane %v429_v57, %v716_v52  ;;  %v496_v20 = vrot.slane %v438_v11, %v713_v51 }
 0x345   :  { %v483_v16 = vsel %vm215_vm1, %v482_v12, %v478_v59 }
 0x346   :  { %v444_v13 = vpop.permute.xlu0 %443  ;;  %v435_v22 = vpop.permute.xlu1 %434  ;;  %v538_v25 = vsel %vm280_vm2, %v483_v16, %v474_v19 }
 0x347   :  { %v491_v63 = vrot.slane %v435_v22, %v716_v52  ;;  %v505_v40 = vrot.slane %v444_v13, %v713_v51 }
 0x349   :  { %v492_v17 = vsel %vm215_vm1, %v491_v63, %v487_v15 }
 0x34a   :  { %v441_v18 = vpop.permute.xlu1 %440  ;;  %v450_v24 = vpop.permute.xlu0 %449  ;;  %v539_v27 = vsel %vm282_vm3, %v492_v17, %v538_v25 }
 0x34b   :  { %v500_v23 = vrot.slane %v441_v18, %v716_v52  ;;  %v514_v35 = vrot.slane %v450_v24, %v713_v51 }
 0x34d   :  { %v501_v26 = vsel %vm215_vm1, %v500_v23, %v496_v20 }
 0x34e   :  { %v447_v28 = vpop.permute.xlu1 %446  ;;  %v540_v29 = vsel %vm284_vm4, %v501_v26, %v539_v27  ;;  %v456_v31 = vpop.permute.xlu0 %455 }
 0x34f   :  { %v546_v30 = vsel %vm293_vm5, %v540_v29, 0.0  ;;  %v509_v36 = vrot.slane %v447_v28, %v716_v52  ;;  %v523_v38 = vrot.slane %v456_v31, %v713_v51 }
 0x350   :  { %547 = vadd.xlane.f32.xlu0 %v546_v30 }
 0x351   :  { %v510_v44 = vsel %vm215_vm1, %v509_v36, %v505_v40 }
 0x352   :  { %v453_v32 = vpop.permute.xlu1 %452  ;;  %v462_v39 = vpop.permute.xlu0 %461 }
 0x353   :  { %v518_v33 = vrot.slane %v453_v32, %v716_v52  ;;  %v532_v45 = vrot.slane %v462_v39, %v713_v51 }
 0x355   :  { %v519_v41 = vsel %vm215_vm1, %v518_v33, %v514_v35 }
 0x356   :  { %v459_v34 = vpop.permute.xlu1 %458  ;;  %v541_v48 = vsel %vm280_vm2, %v519_v41, %v510_v44 }
 0x357   :  { %v527_v37 = vrot.slane %v459_v34, %v716_v52 }
 0x359   :  { %v528_v42 = vsel %vm215_vm1, %v527_v37, %v523_v38 }
 0x35a   :  { %v465_v43 = vpop.permute.xlu1 %464  ;;  %v542_v50 = vsel %vm282_vm3, %v528_v42, %v541_v48 }
 0x35b   :  { %v536_v46 = vrot.slane %v465_v43, %v716_v52 }
 0x35d   :  { %v537_v49 = vsel %vm215_vm1, %v536_v46, %v532_v45 }
 0x35e   :  { %v543_v47 = vsel %vm284_vm4, %v537_v49, %v542_v50 }
 0x35f   :  { %v549_v1 = vsel %vm293_vm5, %v543_v47, 0.0 }
 0x360   :  { %550 = vadd.xlane.f32.xlu1 %v549_v1 }
 0x3dd   :  { %v548_v2 = vpop.xlane.xlu0 %547 }
 0x3de   :  { %v557_v6 = vrot.slane %v548_v2, %v713_v51 }
 0x3ed   :  { %v551_v5 = vpop.xlane.xlu1 %550 }
 0x3ee   :  { %v561_v53 = vrot.slane %v551_v5, %v713_v51 }
 0x3f0   :  { %v562_v52 = vsel %vm280_vm2, %v561_v53, %v557_v6 }
 0x3f1   :  { %565 = vst.msk [vmem:[#allocation7] sm:$0x3] %vm564_vm7, %v562_v52 }
 0x3f2   :  { %638 = shalt.err (!%p635_p12)
}
 0x3f3   :  { %s639_s5 = scalar_lea.hbm %s872_s3, 32 }
 0x3f4   :  { %p640_p13 = scmp.ne.s32.totalorder %s872_s3, %s639_s5  ;;  %p643_p0 = scmp.lt.u32.totalorder %s639_s5, %s872_s3 }
 0x3f6   :  { %p645_p1 = pnand %p643_p0, %p640_p13 }
 0x3f8   :  { %648 = shalt.err (!%p645_p1)
}
 0x3f9   :  { %575 = dma.vmem_to_hbm [thread:$0]  %s573_s28, 32, %s872_s3, [#allocation6]  }
 0x3fa   :  { %651 = dma.done.wait [#allocation6], 32  }
 0x3fb   :  { %652 = vsyncadd [#allocation6], 4294967264 }
 0x3fc   :  { %579 = vsyncpa [#allocation5], 1 }
 0x3fd   :  { %580 = vsyncpa [#allocation6], 1 }

</bundles_post_ra>
